<compile_context>
chip_gen: v6e
topology: v6e:2x2x1
jax: 0.10.0
libtpu: 0.0.40
codegen_flags: <defaults>
</compile_context>

<pallas_src>
import functools

import jax
import jax.numpy as jnp
from jax import lax
from jax.experimental import pallas as pl
from jax.experimental.pallas import tpu as pltpu


def _round_up(x, m):
    return (x + m - 1) // m * m


def _cdiv(a, b):
    return -(-a // b)


# ----------------------------------- kernel -----------------------------------
def _bottleneck_kernel(L, x_ref, w1_ref, w2_ref, w3_ref,
                       b1_ref, b2_ref, b3_ref, o_ref):
    """One row tile of TM = nb*L rows (whole length-L sequences), channels-last.

    x_ref : (TM, Cpi)  f32 input rows (N*L folded into the matmul M dim)
    w1_ref: (Cpi, Cpm); w2_ref: (3, Cpm, Cpm); w3_ref: (Cpm, Cpo)  (compute dtype)
    b*_ref: (1, C)     f32 BN-folded biases
    o_ref : (TM, Cpo)  output rows (out dtype, possibly bf16)
    """
    cdt = w1_ref.dtype                       # matmul compute dtype (bf16 or f32)
    TM = x_ref.shape[0]

    # ---- conv1 (1x1) + bn1 + relu (BN scale folded into w1) ----
    y1 = jnp.dot(x_ref[...].astype(cdt), w1_ref[...],
                 preferred_element_type=jnp.float32)
    y1 = jnp.maximum(y1 + b1_ref[...], 0.0)                      # (TM, Cpm) f32

    # ---- conv2 (k=3, stride=1, pad=1) + bn2 + relu: 3 accumulated K=Cpm dots ----
    # Row tiles hold whole sequences, so halos are sublane rolls with
    # sequence-boundary masking (pos = position within each length-L sequence).
    pos = lax.rem(lax.broadcasted_iota(jnp.int32, y1.shape, 0), L)
    left = jnp.where(pos >= 1, pltpu.roll(y1, shift=1, axis=0), 0.0).astype(cdt)
    right = jnp.where(pos <= L - 2,
                      pltpu.roll(y1, shift=TM - 1, axis=0), 0.0).astype(cdt)
    y2 = jnp.dot(left, w2_ref[0], preferred_element_type=jnp.float32)
    y2 += jnp.dot(y1.astype(cdt), w2_ref[1], preferred_element_type=jnp.float32)
    y2 += jnp.dot(right, w2_ref[2], preferred_element_type=jnp.float32)
    y2 = jnp.maximum(y2 + b2_ref[...], 0.0)                      # (TM, Cpm) f32

    # ---- conv3 (1x1, expansion) + bn3 + identity residual (f32) + relu ----
    y3 = jnp.dot(y2.astype(cdt), w3_ref[...], preferred_element_type=jnp.float32)
    y3 = y3 + b3_ref[...] + x_ref[...].astype(jnp.float32)       # f32 residual
    o_ref[...] = jnp.maximum(y3, 0.0).astype(o_ref.dtype)


# ------------------------------ parameter prep ---------------------------------
def prepare_params(w1_t, w2_t, w3_t, bn1, bn2, bn3, *, eps=1e-5,
                   compute_dtype=jnp.bfloat16):
    """Torch-format weights (Cout, Cin, K) + BN tuples -> kernel-ready arrays.

    Folds the inference-mode BN scale into the conv weights and zero-pads all
    channel axes to multiples of 128 (lane-dense)."""
    Cmid, Cin, _ = w1_t.shape
    Cout = w3_t.shape[0]
    Cpi, Cpm, Cpo = (_round_up(c, 128) for c in (Cin, Cmid, Cout))

    def fold(bn):
        g, b, m, v = bn
        s = g / jnp.sqrt(v + eps)
        return s, b - m * s

    s1, b1 = fold(bn1)
    s2, b2 = fold(bn2)
    s3, b3 = fold(bn3)

    # channels-last weight layouts with BN scale folded into the output axis
    w1 = jnp.transpose(w1_t[:, :, 0]) * s1[None, :]              # (Cin, Cmid)
    w2 = jnp.transpose(w2_t, (2, 1, 0)) * s2[None, None, :]      # (3, Cmid, Cmid)
    w3 = jnp.transpose(w3_t[:, :, 0]) * s3[None, :]              # (Cmid, Cout)

    w1p = jnp.zeros((Cpi, Cpm), jnp.float32).at[:Cin, :Cmid].set(w1)
    w2p = jnp.zeros((3, Cpm, Cpm), jnp.float32).at[:, :Cmid, :Cmid].set(w2)
    w3p = jnp.zeros((Cpm, Cpo), jnp.float32).at[:Cmid, :Cout].set(w3)
    b1p = jnp.zeros((1, Cpm), jnp.float32).at[0, :Cmid].set(b1)
    b2p = jnp.zeros((1, Cpm), jnp.float32).at[0, :Cmid].set(b2)
    b3p = jnp.zeros((1, Cpo), jnp.float32).at[0, :Cout].set(b3)

    return dict(
        w1=w1p.astype(compute_dtype),
        w2=w2p.astype(compute_dtype),                # (3, Cpm, Cpm)
        w3=w3p.astype(compute_dtype),
        b1=b1p, b2=b2p, b3=b3p,                      # biases stay f32
        cin=Cin, cout=Cout)


# --------------------------------- wrapper -------------------------------------
def bottleneck1d_pallas(x_nlc, params, *, out_dtype=None, min_steps=4,
                        vmem_budget_bytes=40 * 1024 * 1024):
    N, L, Cin = x_nlc.shape
    w1, w2, w3 = params["w1"], params["w2"], params["w3"]
    b1, b2, b3 = params["b1"], params["b2"], params["b3"]
    Cpi, Cpm = w1.shape
    Cpo = w3.shape[2] if w3.ndim == 3 else w3.shape[1]
    assert Cpi == w3.shape[-1] and Cin == params["cout"], \
        "identity residual requires in_channels == out_channels*expansion"
    Cpo = w3.shape[-1]
    out_dtype = jnp.dtype(out_dtype if out_dtype is not None else x_nlc.dtype)

    # x stays in its native dtype (f32): the bf16 cast happens in-register inside
    # the kernel, so HBM sees exactly one read of x and the residual stays f32.
    x_p = x_nlc if Cin == Cpi else jnp.pad(x_nlc, ((0, 0), (0, 0), (0, Cpi - Cin)))

    # --- row tiling: whole sequences per tile, big TM, >= min_steps even grid ---
    in_b = x_p.dtype.itemsize
    out_b = out_dtype.itemsize
    # double-buffered x & out tiles + in-kernel f32 intermediates, per row
    per_row = 2 * Cpi * in_b + 2 * Cpo * out_b + 8 * Cpm * 4
    rows_cap = min(4096, max(L, (vmem_budget_bytes // 2) // per_row))
    nb = max(1, min(rows_cap // L, _cdiv(N, min_steps)))       # sequences per tile
    G = _cdiv(N, nb)
    if G > 1 and G % 2:
        G += 1                          # even grid -> both v7x TensorCores busy
    Np = G * nb
    if Np != N:                         # pad with dummy sequences (sliced off below)
        x_p = jnp.pad(x_p, ((0, Np - N), (0, 0), (0, 0)))
    TM = nb * L
    total = Np * L
    assert TM % L == 0 and total % TM == 0   # tiles hold whole sequences
    x_flat = x_p.reshape(total, Cpi)

    flops = 2 * total * (Cpi * Cpm + 3 * Cpm * Cpm + Cpm * Cpo)
    bytes_accessed = (total * Cpi * in_b + total * Cpo * out_b
                      + sum(int(a.size) * a.dtype.itemsize
                            for a in (w1, w2, w3, b1, b2, b3)))

    out = pl.pallas_call(
        functools.partial(_bottleneck_kernel, L),
        out_shape=jax.ShapeDtypeStruct((total, Cpo), out_dtype),
        grid_spec=pltpu.PrefetchScalarGridSpec(
            num_scalar_prefetch=0,
            grid=(G,),
            in_specs=[
                pl.BlockSpec((TM, Cpi), lambda i: (i, 0)),
                pl.BlockSpec((Cpi, Cpm), lambda i: (0, 0)),
                pl.BlockSpec((3, Cpm, Cpm), lambda i: (0, 0, 0)),
                pl.BlockSpec((Cpm, Cpo), lambda i: (0, 0)),
                pl.BlockSpec((1, Cpm), lambda i: (0, 0)),
                pl.BlockSpec((1, Cpm), lambda i: (0, 0)),
                pl.BlockSpec((1, Cpo), lambda i: (0, 0)),
            ],
            out_specs=pl.BlockSpec((TM, Cpo), lambda i: (i, 0)),
        ),
        compiler_params=pltpu.CompilerParams(
            dimension_semantics=("parallel",),
            vmem_limit_bytes=48 * 1024 * 1024),     # fits v7x's 64 MiB physical VMEM
        cost_estimate=pl.CostEstimate(flops=flops, transcendentals=0,
                                      bytes_accessed=bytes_accessed),
    )(x_flat, w1, w2, w3, b1, b2, b3)

    # drop dummy sequences and channel padding
    return out.reshape(Np, L, Cpo)[:N, :, :Cin]


# ------------------------- reference (pure JAX, NCL) ---------------------------
def _bn_eval(y, gamma, beta, mean, var, eps=1e-5):
    inv = gamma / jnp.sqrt(var + eps)
    return (y - mean[None, :, None]) * inv[None, :, None] + beta[None, :, None]


def bottleneck1d_ref(x_ncl, params):
    dn = ('NCH', 'OIH', 'NCH')
    y = lax.conv_general_dilated(x_ncl, params['w1'], (1,), 'VALID', dimension_numbers=dn)
    y = jnp.maximum(_bn_eval(y, *params['bn1']), 0.0)
    y = lax.conv_general_dilated(y, params['w2'], (1,), [(1, 1)], dimension_numbers=dn)
    y = jnp.maximum(_bn_eval(y, *params['bn2']), 0.0)
    y = lax.conv_general_dilated(y, params['w3'], (1,), 'VALID', dimension_numbers=dn)
    y = _bn_eval(y, *params['bn3'])
    return jnp.maximum(y + x_ncl, 0.0)


if __name__ == "__main__":
    # Module config: out_channels=4, expansion=4 -> in_channels = 16 for the
    # identity residual (stride=1, downsample=None).
    N, L = 2, 16
    out_channels = 4
    Cin = out_channels * 4      # 16
    Cmid = out_channels         # 4
    Cout = out_channels * 4     # 16

    key = jax.random.PRNGKey(0)
    ks = jax.random.split(key, 16)

    # Torch-format weights (Cout, Cin, K), no bias.
    w1_t = jax.random.normal(ks[0], (Cmid, Cin, 1), jnp.float32) * 0.1
    w2_t = jax.random.normal(ks[1], (Cmid, Cmid, 3), jnp.float32) * 0.1
    w3_t = jax.random.normal(ks[2], (Cout, Cmid, 1), jnp.float32) * 0.1

    def bn_params(kg, kb, km, kv, c):
        gamma = jax.random.normal(kg, (c,), jnp.float32) * 0.1 + 1.0
        beta = jax.random.normal(kb, (c,), jnp.float32) * 0.1
        mean = jax.random.normal(km, (c,), jnp.float32) * 0.1
        var = jax.random.uniform(kv, (c,), jnp.float32, 0.5, 1.5)
        return gamma, beta, mean, var

    bn1 = bn_params(ks[3], ks[4], ks[5], ks[6], Cmid)
    bn2 = bn_params(ks[7], ks[8], ks[9], ks[10], Cmid)
    bn3 = bn_params(ks[11], ks[12], ks[13], ks[14], Cout)

    x_ncl = jax.random.normal(ks[15], (N, Cin, L), jnp.float32)
    x_nlc = jnp.transpose(x_ncl, (0, 2, 1))            # NCL -> NLC (channels-last)

    ref = bottleneck1d_ref(x_ncl, {'w1': w1_t, 'w2': w2_t, 'w3': w3_t,
                                   'bn1': bn1, 'bn2': bn2, 'bn3': bn3})

    # ---- f32 compute / f32 output (strict-tolerance check path) ----
    p32 = prepare_params(w1_t, w2_t, w3_t, bn1, bn2, bn3,
                         compute_dtype=jnp.float32)
    out32 = jax.block_until_ready(
        bottleneck1d_pallas(x_nlc, p32, out_dtype=jnp.float32))
    out32_ncl = jnp.transpose(out32, (0, 2, 1))
    assert out32_ncl.shape == (N, Cin, L)
    assert jnp.allclose(out32_ncl, ref, atol=1e-4, rtol=1e-4), \
        float(jnp.max(jnp.abs(out32_ncl - ref)))

    # ---- bf16 matmuls + bf16 output, f32 accumulation & residual (perf path,
    #      default on all generations incl. v5e) ----
    pbf = prepare_params(w1_t, w2_t, w3_t, bn1, bn2, bn3,
                         compute_dtype=jnp.bfloat16)
    outbf = jax.block_until_ready(
        bottleneck1d_pallas(x_nlc, pbf, out_dtype=jnp.bfloat16))
    outbf_ncl = jnp.transpose(outbf.astype(jnp.float32), (0, 2, 1))
    assert jnp.allclose(outbf_ncl, ref, atol=5e-2, rtol=5e-2), \
        float(jnp.max(jnp.abs(outbf_ncl - ref)))

    print("KERNEL_OK")
</pallas_src>

<mosaic_0001>
module attributes {stable_mosaic.version = 11 : i64} {
  func.func @_bottleneck_kernel(%arg0: i32, %arg1: memref<16x128xf32, #tpu.memory_space<vmem>>, %arg2: memref<128x128xf32, #tpu.memory_space<vmem>>, %arg3: memref<3x128x128xf32, #tpu.memory_space<vmem>>, %arg4: memref<128x128xf32, #tpu.memory_space<vmem>>, %arg5: memref<1x128xf32, #tpu.memory_space<vmem>>, %arg6: memref<1x128xf32, #tpu.memory_space<vmem>>, %arg7: memref<1x128xf32, #tpu.memory_space<vmem>>, %arg8: memref<16x128xf32, #tpu.memory_space<vmem>>) attributes {dimension_semantics = [#tpu.dimension_semantics<parallel>], iteration_bounds = array<i64: 2>, scalar_prefetch = 0 : i64, scratch_operands = 0 : i64, tpu.core_type = #tpu.core_type<tc>, window_params = [{transform_indices = @transform_0, window_bounds = array<i64: 16, 128>}, {pipeline_mode = #tpu.pipeline_mode<synchronous>, transform_indices = @transform_1, window_bounds = array<i64: 128, 128>}, {pipeline_mode = #tpu.pipeline_mode<synchronous>, transform_indices = @transform_2, window_bounds = array<i64: 3, 128, 128>}, {pipeline_mode = #tpu.pipeline_mode<synchronous>, transform_indices = @transform_3, window_bounds = array<i64: 128, 128>}, {pipeline_mode = #tpu.pipeline_mode<synchronous>, transform_indices = @transform_4, window_bounds = array<i64: 1, 128>}, {pipeline_mode = #tpu.pipeline_mode<synchronous>, transform_indices = @transform_5, window_bounds = array<i64: 1, 128>}, {pipeline_mode = #tpu.pipeline_mode<synchronous>, transform_indices = @transform_6, window_bounds = array<i64: 1, 128>}, {transform_indices = @transform_7, window_bounds = array<i64: 16, 128>}]} {
    %c0 = arith.constant 0 : index
    %c0_0 = arith.constant 0 : index
    %0 = vector.load %arg1[%c0, %c0_0] : memref<16x128xf32, #tpu.memory_space<vmem>>, vector<16x128xf32>
    %c0_1 = arith.constant 0 : index
    %c0_2 = arith.constant 0 : index
    %1 = vector.load %arg2[%c0_1, %c0_2] : memref<128x128xf32, #tpu.memory_space<vmem>>, vector<128x128xf32>
    %cst = arith.constant dense<0.000000e+00> : vector<16x128xf32>
    %2 = tpu.matmul %0, %1, %cst {dimension_numbers = #tpu.dot_dimension_numbers<[1], [0], [0], [1], [0, 0, 1, 1], [], []>} : vector<16x128xf32>, vector<128x128xf32>, vector<16x128xf32> -> vector<16x128xf32>
    %c0_3 = arith.constant 0 : index
    %c0_4 = arith.constant 0 : index
    %3 = vector.load %arg5[%c0_3, %c0_4] : memref<1x128xf32, #tpu.memory_space<vmem>>, vector<1x128xf32>
    %4 = vector.broadcast %3 : vector<1x128xf32> to vector<16x128xf32>
    %5 = arith.addf %2, %4 : vector<16x128xf32>
    %cst_5 = arith.constant 0.000000e+00 : f32
    %6 = vector.broadcast %cst_5 : f32 to vector<16x128xf32>
    %7 = arith.maximumf %5, %6 : vector<16x128xf32>
    %8 = tpu.iota {dimensions = array<i32: 0>} : vector<16x128xi32>
    %c16_i32 = arith.constant 16 : i32
    %9 = vector.broadcast %c16_i32 : i32 to vector<16x128xi32>
    %10 = arith.remsi %8, %9 : vector<16x128xi32>
    %c1_i32 = arith.constant 1 : i32
    %11 = vector.broadcast %c1_i32 : i32 to vector<16x128xi32>
    %12 = arith.cmpi sge, %10, %11 : vector<16x128xi32>
    %c1_i32_6 = arith.constant 1 : i32
    %13 = tpu.dynamic_rotate %7 by %c1_i32_6 dim 0 : vector<16x128xf32>, i32 -> vector<16x128xf32>
    %cst_7 = arith.constant 0.000000e+00 : f32
    %14 = vector.broadcast %cst_7 : f32 to vector<16x128xf32>
    %15 = arith.select %12, %13, %14 : vector<16x128xi1>, vector<16x128xf32>
    %c14_i32 = arith.constant 14 : i32
    %16 = vector.broadcast %c14_i32 : i32 to vector<16x128xi32>
    %17 = arith.cmpi sle, %10, %16 : vector<16x128xi32>
    %c15_i32 = arith.constant 15 : i32
    %18 = tpu.dynamic_rotate %7 by %c15_i32 dim 0 : vector<16x128xf32>, i32 -> vector<16x128xf32>
    %cst_8 = arith.constant 0.000000e+00 : f32
    %19 = vector.broadcast %cst_8 : f32 to vector<16x128xf32>
    %20 = arith.select %17, %18, %19 : vector<16x128xi1>, vector<16x128xf32>
    %c0_9 = arith.constant 0 : index
    %c0_10 = arith.constant 0 : index
    %c0_11 = arith.constant 0 : index
    %21 = vector.load %arg3[%c0_9, %c0_10, %c0_11] : memref<3x128x128xf32, #tpu.memory_space<vmem>>, vector<1x128x128xf32>
    %22 = vector.shape_cast %21 : vector<1x128x128xf32> to vector<128x128xf32>
    %cst_12 = arith.constant dense<0.000000e+00> : vector<16x128xf32>
    %23 = tpu.matmul %15, %22, %cst_12 {dimension_numbers = #tpu.dot_dimension_numbers<[1], [0], [0], [1], [0, 0, 1, 1], [], []>} : vector<16x128xf32>, vector<128x128xf32>, vector<16x128xf32> -> vector<16x128xf32>
    %c1 = arith.constant 1 : index
    %c0_13 = arith.constant 0 : index
    %c0_14 = arith.constant 0 : index
    %24 = vector.load %arg3[%c1, %c0_13, %c0_14] : memref<3x128x128xf32, #tpu.memory_space<vmem>>, vector<1x128x128xf32>
    %25 = vector.shape_cast %24 : vector<1x128x128xf32> to vector<128x128xf32>
    %cst_15 = arith.constant dense<0.000000e+00> : vector<16x128xf32>
    %26 = tpu.matmul %7, %25, %cst_15 {dimension_numbers = #tpu.dot_dimension_numbers<[1], [0], [0], [1], [0, 0, 1, 1], [], []>} : vector<16x128xf32>, vector<128x128xf32>, vector<16x128xf32> -> vector<16x128xf32>
    %27 = arith.addf %23, %26 : vector<16x128xf32>
    %c2 = arith.constant 2 : index
    %c0_16 = arith.constant 0 : index
    %c0_17 = arith.constant 0 : index
    %28 = vector.load %arg3[%c2, %c0_16, %c0_17] : memref<3x128x128xf32, #tpu.memory_space<vmem>>, vector<1x128x128xf32>
    %29 = vector.shape_cast %28 : vector<1x128x128xf32> to vector<128x128xf32>
    %cst_18 = arith.constant dense<0.000000e+00> : vector<16x128xf32>
    %30 = tpu.matmul %20, %29, %cst_18 {dimension_numbers = #tpu.dot_dimension_numbers<[1], [0], [0], [1], [0, 0, 1, 1], [], []>} : vector<16x128xf32>, vector<128x128xf32>, vector<16x128xf32> -> vector<16x128xf32>
    %31 = arith.addf %27, %30 : vector<16x128xf32>
    %c0_19 = arith.constant 0 : index
    %c0_20 = arith.constant 0 : index
    %32 = vector.load %arg6[%c0_19, %c0_20] : memref<1x128xf32, #tpu.memory_space<vmem>>, vector<1x128xf32>
    %33 = vector.broadcast %32 : vector<1x128xf32> to vector<16x128xf32>
    %34 = arith.addf %31, %33 : vector<16x128xf32>
    %cst_21 = arith.constant 0.000000e+00 : f32
    %35 = vector.broadcast %cst_21 : f32 to vector<16x128xf32>
    %36 = arith.maximumf %34, %35 : vector<16x128xf32>
    %c0_22 = arith.constant 0 : index
    %c0_23 = arith.constant 0 : index
    %37 = vector.load %arg4[%c0_22, %c0_23] : memref<128x128xf32, #tpu.memory_space<vmem>>, vector<128x128xf32>
    %cst_24 = arith.constant dense<0.000000e+00> : vector<16x128xf32>
    %38 = tpu.matmul %36, %37, %cst_24 {dimension_numbers = #tpu.dot_dimension_numbers<[1], [0], [0], [1], [0, 0, 1, 1], [], []>} : vector<16x128xf32>, vector<128x128xf32>, vector<16x128xf32> -> vector<16x128xf32>
    %c0_25 = arith.constant 0 : index
    %c0_26 = arith.constant 0 : index
    %39 = vector.load %arg7[%c0_25, %c0_26] : memref<1x128xf32, #tpu.memory_space<vmem>>, vector<1x128xf32>
    %40 = vector.broadcast %39 : vector<1x128xf32> to vector<16x128xf32>
    %41 = arith.addf %38, %40 : vector<16x128xf32>
    %c0_27 = arith.constant 0 : index
    %c0_28 = arith.constant 0 : index
    %42 = vector.load %arg1[%c0_27, %c0_28] : memref<16x128xf32, #tpu.memory_space<vmem>>, vector<16x128xf32>
    %43 = arith.addf %41, %42 : vector<16x128xf32>
    %cst_29 = arith.constant 0.000000e+00 : f32
    %44 = vector.broadcast %cst_29 : f32 to vector<16x128xf32>
    %45 = arith.maximumf %43, %44 : vector<16x128xf32>
    %c0_30 = arith.constant 0 : index
    %c0_31 = arith.constant 0 : index
    %46 = vector.load %arg8[%c0_30, %c0_31] : memref<16x128xf32, #tpu.memory_space<vmem>>, vector<16x128xf32>
    tpu.vector_store %arg8[%c0_30, %c0_31], %45 {strides = array<i32>} : memref<16x128xf32, #tpu.memory_space<vmem>>, vector<16x128xf32>,
    return
  }
  func.func @transform_0(%arg0: i32) -> (i32, i32) {
    %c0_i32 = arith.constant 0 : i32
    %c0_i32_0 = arith.constant 0 : i32
    return %arg0, %c0_i32 : i32, i32
  }
  func.func @transform_1(%arg0: i32) -> (i32, i32) {
    %c0_i32 = arith.constant 0 : i32
    %c0_i32_0 = arith.constant 0 : i32
    %c0_i32_1 = arith.constant 0 : i32
    return %c0_i32, %c0_i32_0 : i32, i32
  }
  func.func @transform_2(%arg0: i32) -> (i32, i32, i32) {
    %c0_i32 = arith.constant 0 : i32
    %c0_i32_0 = arith.constant 0 : i32
    %c0_i32_1 = arith.constant 0 : i32
    %c0_i32_2 = arith.constant 0 : i32
    return %c0_i32, %c0_i32_0, %c0_i32_1 : i32, i32, i32
  }
  func.func @transform_3(%arg0: i32) -> (i32, i32) {
    %c0_i32 = arith.constant 0 : i32
    %c0_i32_0 = arith.constant 0 : i32
    %c0_i32_1 = arith.constant 0 : i32
    return %c0_i32, %c0_i32_0 : i32, i32
  }
  func.func @transform_4(%arg0: i32) -> (i32, i32) {
    %c0_i32 = arith.constant 0 : i32
    %c0_i32_0 = arith.constant 0 : i32
    %c0_i32_1 = arith.constant 0 : i32
    return %c0_i32, %c0_i32_0 : i32, i32
  }
  func.func @transform_5(%arg0: i32) -> (i32, i32) {
    %c0_i32 = arith.constant 0 : i32
    %c0_i32_0 = arith.constant 0 : i32
    %c0_i32_1 = arith.constant 0 : i32
    return %c0_i32, %c0_i32_0 : i32, i32
  }
  func.func @transform_6(%arg0: i32) -> (i32, i32) {
    %c0_i32 = arith.constant 0 : i32
    %c0_i32_0 = arith.constant 0 : i32
    %c0_i32_1 = arith.constant 0 : i32
    return %c0_i32, %c0_i32_0 : i32, i32
  }
  func.func @transform_7(%arg0: i32) -> (i32, i32) {
    %c0_i32 = arith.constant 0 : i32
    %c0_i32_0 = arith.constant 0 : i32
    return %arg0, %c0_i32 : i32, i32
  }
}

</mosaic_0001>

<bundles_post_ra>
// kernel: tpu_custom_call.1
= control target key start
LH: loop header
LB: loop body
LE: loop exit
PB: predicated region body
PF: predicated region fallthrough
CT: control target
= control target key end

     0   :  { %s1853_s0 = inlined_call_operand.hbm [shape: f32[32,128], index: 0, kind: input, shape index: {}]   ;;  %s1854_s1 = inlined_call_operand.hbm [shape: f32[128,128], index: 1, kind: input, shape index: {}]   ;;  %s1855_s2 = inlined_call_operand.hbm [shape: f32[3,128,128], index: 2, kind: input, shape index: {}]   ;;  %s1856_s3 = inlined_call_operand.hbm [shape: f32[128,128], index: 3, kind: input, shape index: {}]   ;;  %s1857_s4 = inlined_call_operand.vmem [shape: f32[1,128], index: 4, kind: input, shape index: {}]   ;;  %s1858_s5 = inlined_call_operand.vmem [shape: f32[1,128], index: 5, kind: input, shape index: {}]   ;;  %s1859_s6 = inlined_call_operand.vmem [shape: f32[1,128], index: 6, kind: input, shape index: {}]   ;;  %s1860_s7 = inlined_call_operand.hbm [shape: f32[32,128], index: 7, kind: output, shape index: {}]  }
   0x1   :  { %1867 = sst [smem:[#allocation15_spill]] %s1854_s1 }
   0x2   :  { %12 = vsyncpa [#allocation3], 0 }
   0x3   :  { %14 = vsyncpa [#allocation3 + $0x1], 0 }
   0x4   :  { %15 = vsyncpa [#allocation6], 0 }
   0x5   :  { %16 = vsyncpa [#allocation9], 0 }
   0x6   :  { %17 = vsyncpa [#allocation4], 0 }
   0x7   :  { %19 = vsyncpa [#allocation4 + $0x1], 0  ;;  %s1590_s24 = smov 0   ;;  %s1592_s25 = smov 0  }
   0x8   :  { %s1594_s26 = smov 0   ;;  %s1596_s27 = smov 0  }
   0x9 LB: > { %s1611_s28 = sadd.s32 4294967295, %s1539_s27   ;;  %s988_s29 = sadd.s32 4294967294, %s1539_s27   ;;  %s1539_s27 = sphi %s1596_s27, %s1891_s27   ;;  %s1535_s26 = sphi %s1594_s26, %s1890_s26   ;;  %s1531_s25 = sphi %s1592_s25, %s1889_s25   ;;  %s1527_s24 = sphi %s1590_s24, %s1888_s24  }
   0xa   : > { %p45_p0 = scmp.ne.s32.totalorder %s1531_s25, %s1527_s24  ;;  %p1861_p1 = scmp.eq.s32.totalorder %s1611_s28, 0 }
   0xb   : > { %p195_p2 = scmp.eq.s32.totalorder %s1611_s28, 1  ;;  %p201_p3 = scmp.eq.s32.totalorder %s988_s29, 1 }
   0xc   : > { %p1620_p4 = por %p1861_p1, %p45_p0  ;;  %p989_p5 = scmp.ge.s32.totalorder %s1539_s27, 1 }
   0xd   : > { %p1625_p6 = por %p201_p3, %p45_p0  ;;  %p208_p7 = scmp.lt.s32.totalorder %s1539_s27, 3 }
   0xe   : > { %s1868_s30 = scalar_select %p1620_p4, 1, 0 }
   0xf   : > { %s1869_s8 = scalar_select %p1625_p6, 1, 0 }
  0x10   : > { %p1630_p8 = pnand %p989_p5, %p208_p7  ;;  %s1541_s10 = smov [#allocation5]  }
  0x11   : > { %s220_s11 = sshll.u32 %s1541_s10, 4  ;;  %s1542_s13 = smov [#allocation7]   ;;  %s221_s11 = int_to_ptr.vmem [resolvable:$true] %s220_s11 }
  0x12   : > { %s1870_s9 = scalar_select %p1630_p8, 1, 0 }
  0x13   : > { %p1296_p9 = pneg %p1630_p8  ;;  %s233_s14 = sshll.u32 %s1542_s13, 4  ;;  %s234_s14 = int_to_ptr.vmem [resolvable:$true] %s233_s14 }
  0x14   : > { %s1543_s15 = smov [#allocation8]   ;;  %s1372_s17 = scalar_lea.vmem %s221_s11, 2048 }
  0x15   : > { %p1639_p11 = pnand %p1296_p9, %p1861_p1  ;;  %s246_s16 = sshll.u32 %s1543_s15, 4  ;;  %s247_s16 = int_to_ptr.vmem [resolvable:$true] %s246_s16 }
  0x16   : > { %p1373_p13 = scmp.ne.s32.totalorder %s221_s11, %s1372_s17  ;;  %p1380_p5 = scmp.lt.s32.totalorder %s221_s11, %s221_s11 }
  0x17   : > { %p1363_p12 = pneg %p1639_p11  ;;  %p1381_p7 = scmp.lt.s32.totalorder %s1372_s17, %s1372_s17 }
  0x19   : > { %p1375_p0 = pnand %p1373_p13, %p1363_p12  ;;  %p1382_p9 = por %p1381_p7, %p1380_p5 }
  0x1b   : > { %p1376_p3 = pneg %p1375_p0 }
  0x1d   : > { %p1383_p10 = pnand %p1382_p9, %p1376_p3 }
  0x1f   : > { %1386 = shalt.err (!%p1383_p10)
}
  0x20   : > { %s1862_s18 = smov 128   ;;  %s1863_s19 = smov 8  }
  0x21   : > { %s1872_s1 = sld [smem:[#allocation15_spill]]  ;;  %s1398_s22 = scalar_lea.vmem %s234_s14, 6144 }
  0x22   : > { %p1399_p13 = scmp.ne.s32.totalorder %s234_s14, %s1398_s22  ;;  %p1406_p3 = scmp.lt.s32.totalorder %s234_s14, %s234_s14 }
  0x23   : > { %p1407_p10 = scmp.lt.s32.totalorder %s1398_s22, %s1398_s22 }
  0x24   : > { %p1401_p0 = pnand %p1399_p13, %p1363_p12 }
  0x25   : > { %p1408_p7 = por %p1407_p10, %p1406_p3 }
  0x26   : > { %p1402_p5 = pneg %p1401_p0 }
  0x27   : > { %1299 = dma.hbm_to_vmem [thread:$0]  (!%p1639_p11), %s1872_s1, 2048, %s221_s11, [#allocation6], %s1862_s18, %s1862_s18, %s1863_s19  }
  0x28   : > { %p1409_p9 = pnand %p1408_p7, %p1402_p5 }
  0x2a   : > { %1412 = shalt.err (!%p1409_p9)
}
  0x2b   : > { %1302 = dma.hbm_to_vmem [thread:$0]  (!%p1639_p11), %s1855_s2, 6144, %s234_s14, [#allocation6], %s1862_s18, %s1862_s18, %s1863_s19  }
  0x2c   : > { %s1424_s10 = scalar_lea.vmem %s247_s16, 2048  ;;  %p1432_p3 = scmp.lt.s32.totalorder %s247_s16, %s247_s16 }
  0x2d   : > { %p1425_p1 = scmp.ne.s32.totalorder %s247_s16, %s1424_s10  ;;  %p1433_p5 = scmp.lt.s32.totalorder %s1424_s10, %s1424_s10 }
  0x2f   : > { %p1427_p13 = pnand %p1425_p1, %p1363_p12  ;;  %p1434_p10 = por %p1433_p5, %p1432_p3 }
  0x31   : > { %p1428_p0 = pneg %p1427_p13 }
  0x33   : > { %p1435_p7 = pnand %p1434_p10, %p1428_p0 }
  0x35   : > { %1438 = shalt.err (!%p1435_p7)
}
  0x36   : > { %1305 = dma.hbm_to_vmem [thread:$0]  (!%p1639_p11), %s1856_s3, 2048, %s247_s16, [#allocation9], %s1862_s18, %s1862_s18, %s1863_s19  }
  0x37   : > { %s1679_s14 = sadd.s32 1, %s1539_s27   ;;  %s32_s15 = sadd.s32 1, %s1535_s26 }
  0x38   : > { %s29_s12 = ssub.s32 %s1539_s27, %s1679_s14  ;;  %p39_p12 = scmp.ne.s32.totalorder %s1535_s26, %s1531_s25 }
  0x39   : > { %p30_p1 = scmp.eq.s32.totalorder %s29_s12, 0  ;;  %p40_p9 = scmp.eq.s32.totalorder %s1539_s27, 0 }
  0x3a   : > { %p1317_p13 = scmp.lt.s32.totalorder %s1539_s27, 2  ;;  %p1693_p3 = por %p195_p2, %p39_p12 }
  0x3b   : > { %s1689_s17 = scalar_select %p30_p1, %s1535_s26, %s32_s15  }
  0x3c   : > { %p41_p0 = por %p40_p9, %p39_p12  ;;  %s269_s21 = sand.u32 1, %s1535_s26  }
  0x3d   : > { %s1873_s20 = scalar_select %p1693_p3, 1, 0 }
  0x3e   : > { %s1013_s22 = sshll.u32 %s1539_s27, 8  ;;  %s994_s16 = sshll.u32 %s269_s21, 4 }
  0x3f   : > { %s1702_s10 = scalar_lea.hbm %s1853_s0, %s1013_s22  ;;  %s273_s11 = scalar_lea.vmem [#allocation2], %s994_s16 }
  0x40   : > { %s280_s13 = sshll.u32 %s273_s11, 4  ;;  %p1704_p11 = pnand %p1317_p13, %p41_p0  ;;  %s1708_s13 = int_to_ptr.vmem [resolvable:$true] %s280_s13 }
  0x41   : > { %s1710_s15 = scalar_lea.sflag [#allocation3], %s269_s21  ;;  %s1439_s18 = scalar_lea.hbm %s1702_s10, 256 }
  0x42   : > { %p1440_p2 = scmp.ne.s32.totalorder %s1702_s10, %s1439_s18  ;;  %p1441_p5 = pneg %p1704_p11 }
  0x43   : > { %s1444_s16 = scalar_lea.hbm %s1853_s0, 512  ;;  %p1445_p1 = scmp.lt.s32.totalorder %s1702_s10, %s1853_s0 }
  0x44   : > { %p1442_p10 = pnand %p1441_p5, %p1440_p2  ;;  %p1446_p12 = scmp.lt.s32.totalorder %s1444_s16, %s1439_s18 }
  0x46   : > { %p1443_p7 = pneg %p1442_p10  ;;  %p1447_p9 = por %p1446_p12, %p1445_p1 }
  0x48   : > { %p1448_p13 = pnand %p1447_p9, %p1443_p7 }
  0x4a   : > { %1451 = shalt.err (!%p1448_p13)
}
  0x4b   : > { %s1452_s21 = scalar_lea.vmem %s1708_s13, 256  ;;  %s1546_s19 = smov [#allocation2]  }
  0x4c   : > { %p1453_p0 = scmp.ne.s32.totalorder %s1708_s13, %s1452_s21  ;;  %s1457_s1 = sshll.u32 %s1546_s19, 4  ;;  %s1458_s1 = int_to_ptr.vmem [resolvable:$false] %s1457_s1 }
  0x4d   : > { %s1459_s22 = scalar_lea.vmem %s1458_s1, 512  ;;  %p1460_p10 = scmp.lt.s32.totalorder %s1708_s13, %s1458_s1 }
  0x4e   : > { %p1455_p6 = pnand %p1453_p0, %p1441_p5  ;;  %p1461_p3 = scmp.lt.s32.totalorder %s1459_s22, %s1452_s21 }
  0x50   : > { %p1456_p2 = pneg %p1455_p6  ;;  %p1462_p4 = por %p1461_p3, %p1460_p10 }
  0x52   : > { %p1463_p8 = pnand %p1462_p4, %p1456_p2 }
  0x54   : > { %1466 = shalt.err (!%p1463_p8)
}
  0x55   : > { %s1875_s18 = smov 8   ;;  %s1876_s23 = smov 128  }
  0x56   : > { %1309 = dma.hbm_to_vmem [thread:$0]  (!%p1704_p11), %s1702_s10, 256, %s1708_s13, %s1710_s15, %s1876_s23, %s1876_s23, %s1875_s18  }
  0x57   : > { %p1877_p6 = scmp.ne.s32.totalorder %s1870_s9, 0 }
  0x58   : > { %s1737_s19 = sand.u32 (!%p1877_p6), 1, %s1531_s25   ;;  %p1878_p4 = scmp.ne.s32.totalorder (!%p1877_p6), %s1868_s30, 0 }
  0x59   : > { %292 = sbr.rel (%p1877_p6) target bundleno = 784 (0x310), region = 48  ;;  %s998_s1 = sshll.u32 (!%p1877_p6), %s1737_s19, 4 }
  0x5a   : > { %s295_s16 = scalar_lea.sflag (!%p1877_p6), [#allocation3], %s1737_s19  ;;  %s1743_s12 = scalar_lea.vmem (!%p1877_p6), [#allocation2], %s998_s1 }
  0x5e   : > { %1510 = dma.done.wait (%p1878_p4), %s295_s16, 256  }
  0x5f   : > { %1512 = vsyncadd (%p1878_p4), %s295_s16, 4294967040  ;;  %p1879_p8 = scmp.eq.s32.totalorder %s1611_s28, 0 }
  0x61   : > { %1514 = dma.done.wait (%p1879_p8), [#allocation6], 8192   ;;  %p1880_p3 = pmov %p1879_p8 }
  0x63   : > { %1516 = vsyncadd (%p1880_p3), [#allocation6], 4294959104  ;;  %p1881_p11 = pmov %p1880_p3 }
  0x64   : > { %p1882_p5 = pmov %p1880_p3 }
  0x65   : > { %1518 = dma.done.wait (%p1881_p11), [#allocation9], 2048  }
  0x66   : > { %1520 = vsyncadd (%p1882_p5), [#allocation9], 4294965248  ;;  %v360_v0 = vld [vmem:[#allocation5 + $0x78] sm:$0xff]  ;;  %v359_v1 = vld [vmem:[#allocation5 + $0x70] sm:$0xff]  ;;  %v445_v51 = vlaneseq  ;;  %s340_s11 = scalar_lea.vmem [#allocation10], %s998_s1  ;;  %s1014_s22 = sshll.u32 %s1611_s28, 8 }
  0x67   : > { %1105 = vmatprep.subr.mxu0 %v360_v0  ;;  %v358_v2 = vld [vmem:[#allocation5 + $0x68] sm:$0xff]  ;;  %v357_v3 = vld [vmem:[#allocation5 + $0x60] sm:$0xff]  ;;  %v356_v5 = vld [vmem:[#allocation5 + $0x58] sm:$0xff]  ;;  %s886_s21 = sshll.u32 %s340_s11, 4  ;;  %s1810_s16 = scalar_lea.hbm %s1860_s7, %s1014_s22  ;;  %s1804_s21 = int_to_ptr.vmem [resolvable:$true] %s886_s21 }
  0x68   : > { %1106 = vmatpush3.msra.mxu0 %v360_v0  ;;  %v1758_v4 = vld [vmem:[%s1743_s12] sm:$0xff]  ;;  %v512_v6 = vld [vmem:[#allocation7 + $0xf8] sm:$0xff]  ;;  %v510_v9 = vld [vmem:[#allocation7 + $0xe8] sm:$0xff]  ;;  %v1768_v53 = vshrl.u32 %v445_v51, 7  ;;  %s873_s1 = scalar_lea.sflag [#allocation4], %s1737_s19  ;;  %p1885_p1 = scmp.ne.s32.totalorder %s1873_s20, 0 }
  0x69   : > { %1107 = vmatprep.subr.mxu0 %v359_v1  ;;  %1137 = vmatprep.mubr.f32.mxu0 %v1758_v4  ;;  %v511_v7 = vld [vmem:[#allocation7 + $0xf0] sm:$0xff]  ;;  %v354_v10 = vld [vmem:[#allocation5 + $0x48] sm:$0xff]  ;;  %v509_v11 = vld [vmem:[#allocation7 + $0xe0] sm:$0xff]  ;;  %s1547_s28 = smov [#allocation10]  }
  0x6a   : > { %1108 = vmatpush3.msra.mxu0 %v359_v1  ;;  %1140 = vmatprep.subr.mxu1 %v512_v6  ;;  %v355_v8 = vld [vmem:[#allocation5 + $0x50] sm:$0xff]  ;;  %v353_v12 = vld [vmem:[#allocation5 + $0x40] sm:$0xff]  ;;  %v508_v13 = vld [vmem:[#allocation7 + $0xd8] sm:$0xff]  ;;  %v452_v57 = vand.u32 15, %v1768_v53  ;;  %vm466_vm1 = vcmp.lt.s32.totalorder %v1768_v53, 1  ;;  %vm475_vm2 = vcmp.lt.s32.totalorder %v1768_v53, 7 }
  0x6b   : > { %1109 = vmatprep.subr.mxu0 %v358_v2  ;;  %1141 = vmatpush3.msra.mxu1 %v512_v6  ;;  %v352_v14 = vld [vmem:[#allocation5 + $0x38] sm:$0xff]  ;;  %v507_v15 = vld [vmem:[#allocation7 + $0xd0] sm:$0xff]  ;;  %v506_v17 = vld [vmem:[#allocation7 + $0xc8] sm:$0xff]  ;;  %s1471_s30 = sshll.u32 %s1547_s28, 4  ;;  %s1472_s30 = int_to_ptr.vmem [resolvable:$false] %s1471_s30 }
  0x6c   : > { %1110 = vmatpush3.msra.mxu0 %v358_v2  ;;  %1142 = vmatprep.subr.mxu1 %v511_v7  ;;  %v351_v16 = vld [vmem:[#allocation5 + $0x30] sm:$0xff]  ;;  %v350_v18 = vld [vmem:[#allocation5 + $0x28] sm:$0xff]  ;;  %v505_v19 = vld [vmem:[#allocation7 + $0xc0] sm:$0xff]  ;;  %vm1775_vm0 = vcmp.ge.s32.totalorder %v452_v57, 1  ;;  %s1473_s9 = scalar_lea.vmem %s1472_s30, 512  ;;  %p1474_p13 = scmp.lt.s32.totalorder %s1804_s21, %s1472_s30 }
  0x6d   : > { %1111 = vmatprep.subr.mxu0 %v357_v3  ;;  %1143 = vmatpush3.msra.mxu1 %v511_v7  ;;  %v349_v20 = vld [vmem:[#allocation5 + $0x20] sm:$0xff]  ;;  %v504_v21 = vld [vmem:[#allocation7 + $0xb8] sm:$0xff]  ;;  %v503_v23 = vld [vmem:[#allocation7 + $0xb0] sm:$0xff] }
  0x6e   : > { %1112 = vmatpush3.msra.mxu0 %v357_v3  ;;  %1144 = vmatprep.subr.mxu1 %v510_v9  ;;  %v348_v22 = vld [vmem:[#allocation5 + $0x18] sm:$0xff]  ;;  %v347_v24 = vld [vmem:[#allocation5 + $0x10] sm:$0xff]  ;;  %v502_v25 = vld [vmem:[#allocation7 + $0xa8] sm:$0xff] }
  0x6f   : > { %1113 = vmatprep.subr.mxu0 %v356_v5  ;;  %1145 = vmatpush3.msra.mxu1 %v510_v9  ;;  %v346_v26 = vld [vmem:[#allocation5 + $0x8] sm:$0xff]  ;;  %v501_v27 = vld [vmem:[#allocation7 + $0xa0] sm:$0xff]  ;;  %v500_v29 = vld [vmem:[#allocation7 + $0x98] sm:$0xff] }
  0x70   : > { %1114 = vmatpush3.msra.mxu0 %v356_v5  ;;  %1146 = vmatprep.subr.mxu1 %v509_v11  ;;  %v345_v28 = vld [vmem:[#allocation5] sm:$0xff]  ;;  %v1762_v30 = vld [vmem:[%s1743_s12 + $0x8] sm:$0xff]  ;;  %v494_v32 = vld [vmem:[#allocation7 + $0x70] sm:$0xff]  ;;  %s1467_s12 = scalar_lea.vmem %s1804_s21, 256 }
  0x71   : > { %1115 = vmatprep.subr.mxu0 %v355_v8  ;;  %1147 = vmatpush3.msra.mxu1 %v509_v11  ;;  %v495_v31 = vld [vmem:[#allocation7 + $0x78] sm:$0xff]  ;;  %v493_v33 = vld [vmem:[#allocation7 + $0x68] sm:$0xff]  ;;  %v492_v34 = vld [vmem:[#allocation7 + $0x60] sm:$0xff]  ;;  %p1468_p7 = scmp.ne.s32.totalorder %s1804_s21, %s1467_s12  ;;  %p1475_p0 = scmp.lt.s32.totalorder %s1473_s9, %s1467_s12 }
  0x72   : > { %1116 = vmatpush3.msra.mxu0 %v355_v8  ;;  %1148 = vmatprep.subr.mxu1 %v508_v13  ;;  %v491_v35 = vld [vmem:[#allocation7 + $0x58] sm:$0xff]  ;;  %v490_v36 = vld [vmem:[#allocation7 + $0x50] sm:$0xff]  ;;  %v489_v37 = vld [vmem:[#allocation7 + $0x48] sm:$0xff] }
  0x73   : > { %1117 = vmatprep.subr.mxu0 %v354_v10  ;;  %1149 = vmatpush3.msra.mxu1 %v508_v13  ;;  %v488_v38 = vld [vmem:[#allocation7 + $0x40] sm:$0xff]  ;;  %v487_v39 = vld [vmem:[#allocation7 + $0x38] sm:$0xff]  ;;  %v486_v40 = vld [vmem:[#allocation7 + $0x30] sm:$0xff]  ;;  %p1469_p12 = pnand %p1468_p7, %p1885_p1  ;;  %p1476_p2 = por %p1475_p0, %p1474_p13 }
  0x74   : > { %1118 = vmatpush3.msra.mxu0 %v354_v10  ;;  %1150 = vmatprep.subr.mxu1 %v507_v15  ;;  %v485_v41 = vld [vmem:[#allocation7 + $0x28] sm:$0xff]  ;;  %v499_v42 = vld [vmem:[#allocation7 + $0x90] sm:$0xff]  ;;  %v484_v43 = vld [vmem:[#allocation7 + $0x20] sm:$0xff] }
  0x75   : > { %1119 = vmatprep.subr.mxu0 %v353_v12  ;;  %1151 = vmatpush3.msra.mxu1 %v507_v15  ;;  %v498_v44 = vld [vmem:[#allocation7 + $0x88] sm:$0xff]  ;;  %v483_v45 = vld [vmem:[#allocation7 + $0x18] sm:$0xff]  ;;  %v497_v46 = vld [vmem:[#allocation7 + $0x80] sm:$0xff]  ;;  %p1470_p9 = pneg %p1469_p12 }
  0x76   : > { %1120 = vmatpush3.msra.mxu0 %v353_v12  ;;  %1152 = vmatprep.subr.mxu1 %v506_v17  ;;  %v482_v47 = vld [vmem:[#allocation7 + $0x10] sm:$0xff]  ;;  %v481_v48 = vld [vmem:[#allocation7 + $0x8] sm:$0xff]  ;;  %v679_v49 = vld [vmem:[#allocation7 + $0x178] sm:$0xff] }
  0x77   : > { %1121 = vmatprep.subr.mxu0 %v352_v14  ;;  %1153 = vmatpush3.msra.mxu1 %v506_v17  ;;  %v480_v50 = vld [vmem:[#allocation7] sm:$0xff]  ;;  %v678_v2 = vld [vmem:[#allocation7 + $0x170] sm:$0xff]  ;;  %v677_v7 = vld [vmem:[#allocation7 + $0x168] sm:$0xff]  ;;  %p1477_p10 = pnand %p1476_p2, %p1470_p9 }
  0x78   : > { %1122 = vmatpush3.msra.mxu0 %v352_v14  ;;  %1154 = vmatprep.subr.mxu1 %v505_v19  ;;  %v1003_v52 = vld [vmem:[%s1857_s4] ss:$0 sm:$0xff]  ;;  %v675_v9 = vld [vmem:[#allocation7 + $0x158] sm:$0xff]  ;;  %v674_v10 = vld [vmem:[#allocation7 + $0x150] sm:$0xff] }
  0x79   : > { %1123 = vmatprep.subr.mxu0 %v351_v16  ;;  %1155 = vmatpush3.msra.mxu1 %v505_v19  ;;  %v676_v8 = vld [vmem:[#allocation7 + $0x160] sm:$0xff]  ;;  %v673_v11 = vld [vmem:[#allocation7 + $0x148] sm:$0xff]  ;;  %v671_v13 = vld [vmem:[#allocation7 + $0x138] sm:$0xff] }
  0x7a   : > { %1124 = vmatpush3.msra.mxu0 %v351_v16  ;;  %1156 = vmatprep.subr.mxu1 %v504_v21  ;;  %v672_v12 = vld [vmem:[#allocation7 + $0x140] sm:$0xff]  ;;  %v670_v14 = vld [vmem:[#allocation7 + $0x130] sm:$0xff]  ;;  %v669_v15 = vld [vmem:[#allocation7 + $0x128] sm:$0xff] }
  0x7b   : > { %1125 = vmatprep.subr.mxu0 %v350_v18  ;;  %1157 = vmatpush3.msra.mxu1 %v504_v21  ;;  %v668_v16 = vld [vmem:[#allocation7 + $0x120] sm:$0xff]  ;;  %v667_v17 = vld [vmem:[#allocation7 + $0x118] sm:$0xff]  ;;  %v666_v19 = vld [vmem:[#allocation7 + $0x110] sm:$0xff] }
  0x7c   : > { %1126 = vmatpush3.msra.mxu0 %v350_v18  ;;  %1158 = vmatprep.subr.mxu1 %v503_v23  ;;  %v447_v18 = vadd.s32 8, %v1768_v53 }
  0x7d   : > { %1127 = vmatprep.subr.mxu0 %v349_v20  ;;  %1159 = vmatpush3.msra.mxu1 %v503_v23 }
  0x7e   : > { %1128 = vmatpush3.msra.mxu0 %v349_v20  ;;  %1160 = vmatprep.subr.mxu1 %v502_v25  ;;  %v665_v20 = vld [vmem:[#allocation7 + $0x108] sm:$0xff]  ;;  %v459_v21 = vand.u32 15, %v447_v18 }
  0x7f   : > { %1129 = vmatprep.subr.mxu0 %v348_v22  ;;  %1161 = vmatpush3.msra.mxu1 %v502_v25  ;;  %v782_v25 = vld [vmem:[#allocation8 + $0x70] sm:$0xff] }
  0x80   : > { %1130 = vmatpush3.msra.mxu0 %v348_v22  ;;  %1162 = vmatprep.subr.mxu1 %v501_v27  ;;  %v664_v22 = vld [vmem:[#allocation7 + $0x100] sm:$0xff]  ;;  %vm472_vm3 = vcmp.le.s32.totalorder %v459_v21, 14 }
  0x81   : > { %1131 = vmatprep.subr.mxu0 %v347_v24  ;;  %1163 = vmatpush3.msra.mxu1 %v501_v27  ;;  %v780_v27 = vld [vmem:[#allocation8 + $0x60] sm:$0xff] }
  0x82   : > { %1132 = vmatpush3.msra.mxu0 %v347_v24  ;;  %1164 = vmatprep.subr.mxu1 %v500_v29  ;;  %v783_v24 = vld [vmem:[#allocation8 + $0x78] sm:$0xff] }
  0x83   : > { %1133 = vmatprep.subr.mxu0 %v346_v26  ;;  %1165 = vmatpush3.msra.mxu1 %v500_v29  ;;  %v778_v29 = vld [vmem:[#allocation8 + $0x50] sm:$0xff] }
  0x84   : > { %1134 = vmatpush3.msra.mxu0 %v346_v26  ;;  %1166 = vmatprep.subr.mxu1 %v499_v42  ;;  %v781_v26 = vld [vmem:[#allocation8 + $0x68] sm:$0xff] }
  0x85   : > { %1135 = vmatprep.subr.mxu0 %v345_v28  ;;  %1167 = vmatpush3.msra.mxu1 %v499_v42 }
  0x86   : > { %1136 = vmatpush3.msra.mxu0 %v345_v28  ;;  %1168 = vmatprep.subr.mxu1 %v498_v44  ;;  %v779_v28 = vld [vmem:[#allocation8 + $0x58] sm:$0xff] }
  0x87   : > { %1138 = vmatmul.mubr.f32.vlgmr.msra.gmra.mxu0 %v1762_v30  ;;  %1175 = vmatprep.subr.mxu0 %v495_v31 }
  0x88   : > { %1176 = vmatpush3.msra.mxu0 %v495_v31  ;;  %1169 = vmatpush3.msra.mxu1 %v498_v44  ;;  %v777_v31 = vld [vmem:[#allocation8 + $0x48] sm:$0xff] }
  0x89   : > { %1177 = vmatprep.subr.mxu0 %v494_v32  ;;  %1170 = vmatprep.subr.mxu1 %v497_v46 }
  0x8a   : > { %1178 = vmatpush3.msra.mxu0 %v494_v32  ;;  %1171 = vmatpush3.msra.mxu1 %v497_v46  ;;  %v776_v32 = vld [vmem:[#allocation8 + $0x40] sm:$0xff] }
  0x8b   : > { %1179 = vmatprep.subr.mxu0 %v493_v33  ;;  %1210 = vmatprep.subr.mxu1 %v679_v49 }
  0x8c   : > { %1180 = vmatpush3.msra.mxu0 %v493_v33  ;;  %v775_v33 = vld [vmem:[#allocation8 + $0x38] sm:$0xff] }
  0x8d   : > { %1181 = vmatprep.subr.mxu0 %v492_v34 }
  0x8e   : > { %1182 = vmatpush3.msra.mxu0 %v492_v34  ;;  %v774_v34 = vld [vmem:[#allocation8 + $0x30] sm:$0xff] }
  0x8f   : > { %1183 = vmatprep.subr.mxu0 %v491_v35 }
  0x90   : > { %1184 = vmatpush3.msra.mxu0 %v491_v35  ;;  %v773_v35 = vld [vmem:[#allocation8 + $0x28] sm:$0xff] }
  0x91   : > { %1185 = vmatprep.subr.mxu0 %v490_v36 }
  0x92   : > { %1186 = vmatpush3.msra.mxu0 %v490_v36  ;;  %v772_v36 = vld [vmem:[#allocation8 + $0x20] sm:$0xff] }
  0x93   : > { %1187 = vmatprep.subr.mxu0 %v489_v37 }
  0x94   : > { %1188 = vmatpush3.msra.mxu0 %v489_v37  ;;  %v771_v37 = vld [vmem:[#allocation8 + $0x18] sm:$0xff] }
  0x95   : > { %1189 = vmatprep.subr.mxu0 %v488_v38 }
  0x96   : > { %1190 = vmatpush3.msra.mxu0 %v488_v38  ;;  %v770_v38 = vld [vmem:[#allocation8 + $0x10] sm:$0xff] }
  0x97   : > { %1191 = vmatprep.subr.mxu0 %v487_v39 }
  0x98   : > { %1192 = vmatpush3.msra.mxu0 %v487_v39  ;;  %v769_v39 = vld [vmem:[#allocation8 + $0x8] sm:$0xff] }
  0x99   : > { %1193 = vmatprep.subr.mxu0 %v486_v40 }
  0x9a   : > { %1194 = vmatpush3.msra.mxu0 %v486_v40  ;;  %v768_v40 = vld [vmem:[#allocation8] sm:$0xff] }
  0x9b   : > { %1195 = vmatprep.subr.mxu0 %v485_v41 }
  0x9c   : > { %1196 = vmatpush3.msra.mxu0 %v485_v41 }
  0x9d   : > { %1197 = vmatprep.subr.mxu0 %v484_v43 }
  0x9e   : > { %1198 = vmatpush3.msra.mxu0 %v484_v43 }
  0x9f   : > { %1199 = vmatprep.subr.mxu0 %v483_v45 }
  0xa0   : > { %1200 = vmatpush3.msra.mxu0 %v483_v45 }
  0xa1   : > { %1201 = vmatprep.subr.mxu0 %v482_v47 }
  0xa2   : > { %1202 = vmatpush3.msra.mxu0 %v482_v47 }
  0xa3   : > { %1203 = vmatprep.subr.mxu0 %v481_v48 }
  0xa4   : > { %1204 = vmatpush3.msra.mxu0 %v481_v48 }
  0xa5   : > { %1205 = vmatprep.subr.mxu0 %v480_v50 }
  0xa6   : > { %1206 = vmatpush3.msra.mxu0 %v480_v50 }
  0xa7   : > { %1245 = vmatprep.subr.mxu0 %v783_v24 }
 0x147   : > { %v1139_v54 = vpop.f32.mrf.mxu0 }
 0x148   : > { %v440_v55 = vadd.f32 %v1139_v54, %v1003_v52 }
 0x149   : > { %v434_v56 = vpop.f32.mrf.mxu0 }
 0x14a   : > { %v1771_v58 = vmax.f32 %v440_v55, 0.0  ;;  %v435_v59 = vadd.f32 %v1003_v52, %v434_v56  ;;  %v1007_v56 = vld [vmem:[%s1859_s6] ss:$0 sm:$0xff] }
 0x14c   : > { %v1773_v60 = vmax.f32 %v435_v59, 0.0  ;;  %v465_v62 = vrot.slane %v1771_v58, 7  ;;  %v474_v63 = vrot.slane %v1771_v58, 1 }
 0x14e   : > { %v464_v0 = vrot.slane %v1773_v60, 7  ;;  %v473_v1 = vrot.slane %v1773_v60, 1  ;;  %1172 = vmatprep.mubr.f32.mxu1 %v1773_v60 }
 0x14f   : > { %1173 = vmatmul.mubr.f32.vlgmr.msra.gmra.mxu1 %v1771_v58 }
 0x150   : > { %1211 = vmatpush3.msra.mxu1 %v679_v49  ;;  %v468_v3 = vsel %vm466_vm1, %v465_v62, %v464_v0  ;;  %v476_v5 = vsel %vm475_vm2, %v473_v1, %v474_v63  ;;  %v467_v6 = vsel %vm466_vm1, %v464_v0, %v465_v62  ;;  %v477_v23 = vsel %vm475_vm2, %v474_v63, %v473_v1  ;;  %v1006_v49 = vld [vmem:[%s1858_s5] ss:$0 sm:$0xff] }
 0x151   : > { %1212 = vmatprep.subr.mxu1 %v678_v2  ;;  %1207 = vmatprep.mubr.msk.f32.mxu0 %vm1775_vm0, %v468_v3 }
 0x152   : > { %1213 = vmatpush3.msra.mxu1 %v678_v2  ;;  %1242 = vmatprep.mubr.f32.mxu1 %v476_v5 }
 0x153   : > { %1208 = vmatmul.mubr.f32.vlgmr.msra.gmra.mxu0 %v467_v6  ;;  %1214 = vmatprep.subr.mxu1 %v677_v7 }
 0x154   : > { %1215 = vmatpush3.msra.mxu1 %v677_v7  ;;  %1246 = vmatpush3.msra.mxu0 %v783_v24 }
 0x155   : > { %1216 = vmatprep.subr.mxu1 %v676_v8  ;;  %1247 = vmatprep.subr.mxu0 %v782_v25 }
 0x156   : > { %1217 = vmatpush3.msra.mxu1 %v676_v8  ;;  %1248 = vmatpush3.msra.mxu0 %v782_v25 }
 0x157   : > { %1218 = vmatprep.subr.mxu1 %v675_v9  ;;  %1249 = vmatprep.subr.mxu0 %v781_v26 }
 0x158   : > { %1219 = vmatpush3.msra.mxu1 %v675_v9  ;;  %1250 = vmatpush3.msra.mxu0 %v781_v26 }
 0x159   : > { %1220 = vmatprep.subr.mxu1 %v674_v10  ;;  %1251 = vmatprep.subr.mxu0 %v780_v27 }
 0x15a   : > { %1221 = vmatpush3.msra.mxu1 %v674_v10  ;;  %1252 = vmatpush3.msra.mxu0 %v780_v27 }
 0x15b   : > { %1222 = vmatprep.subr.mxu1 %v673_v11  ;;  %1253 = vmatprep.subr.mxu0 %v779_v28 }
 0x15c   : > { %1223 = vmatpush3.msra.mxu1 %v673_v11  ;;  %1254 = vmatpush3.msra.mxu0 %v779_v28 }
 0x15d   : > { %1224 = vmatprep.subr.mxu1 %v672_v12  ;;  %1255 = vmatprep.subr.mxu0 %v778_v29 }
 0x15e   : > { %1225 = vmatpush3.msra.mxu1 %v672_v12  ;;  %1256 = vmatpush3.msra.mxu0 %v778_v29 }
 0x15f   : > { %1226 = vmatprep.subr.mxu1 %v671_v13  ;;  %1257 = vmatprep.subr.mxu0 %v777_v31 }
 0x160   : > { %1227 = vmatpush3.msra.mxu1 %v671_v13  ;;  %1258 = vmatpush3.msra.mxu0 %v777_v31 }
 0x161   : > { %1228 = vmatprep.subr.mxu1 %v670_v14  ;;  %1259 = vmatprep.subr.mxu0 %v776_v32 }
 0x162   : > { %1229 = vmatpush3.msra.mxu1 %v670_v14  ;;  %1260 = vmatpush3.msra.mxu0 %v776_v32 }
 0x163   : > { %1230 = vmatprep.subr.mxu1 %v669_v15  ;;  %1261 = vmatprep.subr.mxu0 %v775_v33 }
 0x164   : > { %1231 = vmatpush3.msra.mxu1 %v669_v15  ;;  %1262 = vmatpush3.msra.mxu0 %v775_v33 }
 0x165   : > { %1232 = vmatprep.subr.mxu1 %v668_v16  ;;  %1263 = vmatprep.subr.mxu0 %v774_v34 }
 0x166   : > { %1233 = vmatpush3.msra.mxu1 %v668_v16  ;;  %1264 = vmatpush3.msra.mxu0 %v774_v34 }
 0x167   : > { %1234 = vmatprep.subr.mxu1 %v667_v17  ;;  %1265 = vmatprep.subr.mxu0 %v773_v35 }
 0x168   : > { %1235 = vmatpush3.msra.mxu1 %v667_v17  ;;  %1266 = vmatpush3.msra.mxu0 %v773_v35 }
 0x169   : > { %1236 = vmatprep.subr.mxu1 %v666_v19  ;;  %1267 = vmatprep.subr.mxu0 %v772_v36 }
 0x16a   : > { %1237 = vmatpush3.msra.mxu1 %v666_v19  ;;  %1268 = vmatpush3.msra.mxu0 %v772_v36 }
 0x16b   : > { %1238 = vmatprep.subr.mxu1 %v665_v20  ;;  %1269 = vmatprep.subr.mxu0 %v771_v37 }
 0x16c   : > { %1239 = vmatpush3.msra.mxu1 %v665_v20  ;;  %1270 = vmatpush3.msra.mxu0 %v771_v37 }
 0x16d   : > { %1240 = vmatprep.subr.mxu1 %v664_v22  ;;  %1271 = vmatprep.subr.mxu0 %v770_v38 }
 0x16e   : > { %1241 = vmatpush3.msra.mxu1 %v664_v22  ;;  %1272 = vmatpush3.msra.mxu0 %v770_v38 }
 0x16f   : > { %1243 = vmatmul.mubr.msk.f32.vlgmr.msra.gmra.mxu1 %vm472_vm3, %v477_v23  ;;  %1273 = vmatprep.subr.mxu0 %v769_v39 }
 0x170   : > { %1274 = vmatpush3.msra.mxu0 %v769_v39 }
 0x171   : > { %1275 = vmatprep.subr.mxu0 %v768_v40 }
 0x172   : > { %1276 = vmatpush3.msra.mxu0 %v768_v40 }
 0x20f   : > { %v1174_v41 = vpop.f32.mrf.mxu1 }
 0x211   : > { %v579_v43 = vpop.f32.mrf.mxu1 }
 0x213   : > { %v1209_v42 = vpop.f32.mrf.mxu0 }
 0x214   : > { %v660_v45 = vadd.f32 %v1209_v42, %v1174_v41 }
 0x215   : > { %v654_v44 = vpop.f32.mrf.mxu0 }
 0x216   : > { %v655_v47 = vadd.f32 %v654_v44, %v579_v43 }
 0x22f   : > { %v1244_v46 = vpop.f32.mrf.mxu1 }
 0x230   : > { %v756_v48 = vadd.f32 %v1244_v46, %v660_v45 }
 0x231   : > { %v746_v50 = vpop.f32.mrf.mxu1 }
 0x232   : > { %v755_v51 = vadd.f32 %v746_v50, %v655_v47  ;;  %v765_v52 = vadd.f32 %v1006_v49, %v756_v48 }
 0x234   : > { %v764_v53 = vadd.f32 %v1006_v49, %v755_v51  ;;  %v767_v55 = vmax.f32 %v765_v52, 0.0 }
 0x236   : > { %v766_v54 = vmax.f32 %v764_v53, 0.0 }
 0x238   : > { %1277 = vmatprep.mubr.f32.mxu0 %v766_v54 }
 0x239   : > { %1278 = vmatmul.mubr.f32.vlgmr.msra.gmra.mxu0 %v767_v55 }
 0x2f9   : > { %v1279_v57 = vpop.f32.mrf.mxu0 }
 0x2fa   : > { %v863_v58 = vadd.f32 %v1279_v57, %v1007_v56 }
 0x2fb   : > { %v857_v59 = vpop.f32.mrf.mxu0 }
 0x2fc   : > { %v867_v60 = vadd.f32 %v863_v58, %v1762_v30  ;;  %v858_v61 = vadd.f32 %v1007_v56, %v857_v59 }
 0x2fe   : > { %v869_v62 = vmax.f32 %v867_v60, 0.0  ;;  %v866_v63 = vadd.f32 %v858_v61, %v1758_v4 }
 0x300   : > { %871 = vst [vmem:[%s340_s11 + $0x8] sm:$0xff] %v869_v62  ;;  %v868_v0 = vmax.f32 %v866_v63, 0.0 }
 0x302   : > { %870 = vst [vmem:[%s340_s11] sm:$0xff] %v868_v0 }
 0x303   : > { %1480 = shalt.err (!%p1477_p10)
}
 0x304   : > { %s1481_s10 = scalar_lea.hbm %s1810_s16, 256  ;;  %s1485_s29 = scalar_lea.hbm %s1860_s7, 512 }
 0x305   : > { %p1482_p6 = scmp.ne.s32.totalorder %s1810_s16, %s1481_s10  ;;  %p1486_p3 = scmp.lt.s32.totalorder %s1810_s16, %s1860_s7 }
 0x306   : > { %p1487_p11 = scmp.lt.s32.totalorder %s1485_s29, %s1481_s10 }
 0x307   : > { %p1483_p4 = pnand %p1482_p6, %p1885_p1 }
 0x308   : > { %p1488_p5 = por %p1487_p11, %p1486_p3 }
 0x309   : > { %p1484_p8 = pneg %p1483_p4 }
 0x30b   : > { %p1489_p7 = pnand %p1488_p5, %p1484_p8 }
 0x30d   : > { %1492 = shalt.err (!%p1489_p7)
}
 0x30e   : > { %s1548_s18 = smov 128   ;;  %s1549_s23 = smov 8  }
 0x30f   : > { %1294 = dma.vmem_to_hbm [thread:$0]  (%p1885_p1), %s1804_s21, 256, %s1810_s16, %s873_s1, %s1548_s18, %s1548_s18, %s1549_s23  }
 0x310 PF: > { %s901_s12 = sand.u32 1, %s1527_s24   ;;  %p1886_p12 = scmp.ne.s32.totalorder %s1869_s8, 0 }
 0x311   : > { %p1887_p9 = scmp.ge.s32.totalorder %s1539_s27, 2  ;;  %s902_s28 = scalar_lea.sflag [#allocation4], %s901_s12 }
 0x313   : > { %p1311_p13 = pnand %p1887_p9, %p1886_p12 }
 0x315   : > { %p1312_p0 = pneg %p1311_p13 }
 0x317   : > { %1522 = dma.done.wait (%p1312_p0), %s902_s28, 256  }
 0x318   : > { %1524 = vsyncadd (%p1312_p0), %s902_s28, 4294967040  ;;  %p22_p2 = scmp.ge.s32.totalorder %s1679_s14, 4   ;;  %s1888_s24 = smov %s1531_s25 }
 0x319   : > { %s1889_s25 = smov %s1535_s26  ;;  %s1890_s26 = smov %s1689_s17 }
 0x31a   : > { %s1891_s27 = smov %s1679_s14  ;;  %24 = sbr.rel (!%p22_p2) target bundleno = 9 (0x9), region = 107 }
 0x31f   :  { %907 = vsyncpa [#allocation3], 1 }
 0x320   :  { %909 = vsyncpa [#allocation3 + $0x1], 1 }
 0x321   :  { %910 = vsyncpa [#allocation6], 1 }
 0x322   :  { %911 = vsyncpa [#allocation9], 1 }
 0x323   :  { %912 = vsyncpa [#allocation4], 1 }
 0x324   :  { %914 = vsyncpa [#allocation4 + $0x1], 1 }

</bundles_post_ra>
